<compile_context>
chip_gen: v6e
topology: v6e:2x2x1
jax: 0.10.0
libtpu: 0.0.40
codegen_flags: <defaults>
</compile_context>

<pallas_src>
import jax
import jax.numpy as jnp
from jax.experimental import pallas as pl
from jax.experimental.pallas import tpu as pltpu


def gru_recurrence_kernel(xproj_ref, w_hz_ref, b_hz_ref, h_ref):
    """One time-chunk of the GRU recurrence.

    xproj_ref: (Tc, B, 2H)  precomputed [x@W_x_r + b_r | x@W_n + b_n]
    w_hz_ref:  (H, 2H)      fused [W_h_r | W_z]
    b_hz_ref:  (1, 2H)      fused [0 | b_z]
    h_ref:     (B, H)       resident output block, carries h across chunks
    """
    c = pl.program_id(0)
    Tc, B, H2 = xproj_ref.shape
    H = H2 // 2

    # h = zeros(B, H) before the first chunk.
    @pl.when(c == 0)
    def _():
        h_ref[...] = jnp.zeros_like(h_ref)

    # Hoist constant loads / broadcasts out of the time loop
    # (JAX does not CSE broadcast_in_dim).
    w_hz = w_hz_ref[...]                                   # (H, 2H)
    b_hz = jnp.broadcast_to(b_hz_ref[...], (B, H2))        # (B, 2H)

    def step(t, h):
        x_t = xproj_ref[t]                                 # (B, 2H)
        # Single fused MXU dot per step: [h@W_h_r | h@W_z] (+ [0 | b_z]).
        hw = jnp.dot(h, w_hz, preferred_element_type=jnp.float32) + b_hz
        # r = sigmoid(input_to_hidden(cat(x_t, h)))
        r = jax.nn.sigmoid(x_t[:, :H] + hw[:, :H])
        # z = sigmoid(hidden_to_hidden(h))
        z = jax.nn.sigmoid(hw[:, H:])
        # n = tanh(candidate_to_hidden(x_t) + r * h)
        n = jnp.tanh(x_t[:, H:] + r * h)
        # h = (1 - z) * n + z * h
        return (1.0 - z) * n + z * h

    # h stays register-resident for the whole chunk; spill once at the end.
    h_ref[...] = jax.lax.fori_loop(0, Tc, step, h_ref[...], unroll=True)


def basic_gru_forward(tokens, params, *, time_chunk=4):
    """tokens: int32 (B, T).  Returns logits (B, V) float32."""
    emb_tbl = params["embedding"]                          # (V, E)
    B, T = tokens.shape
    E = emb_tbl.shape[1]
    H = params["b_r"].shape[-1]
    V = params["b_o"].shape[-1]
    assert E == H, "candidate_to_hidden applied to embedding requires E == H"

    Tc = min(time_chunk, T)
    assert T % Tc == 0, "time_chunk must divide T"
    n_chunks = T // Tc

    # ---- glue + hoisted input projections (plain XLA, one big matmul) -------
    emb = jnp.take(emb_tbl, tokens, axis=0)                # (B, T, E) gather
    emb = jnp.transpose(emb, (1, 0, 2))                    # (T, B, E)
    w_x = jnp.concatenate([params["w_x_r"], params["w_n"]], axis=1)   # (E, 2H)
    b_x = jnp.concatenate([params["b_r"], params["b_n"]], axis=1)     # (1, 2H)
    xproj = (emb.reshape(T * B, E) @ w_x + b_x).reshape(T, B, 2 * H)

    # Fused per-step hidden weights / bias for the in-kernel recurrence.
    w_hz = jnp.concatenate([params["w_h_r"], params["w_z"]], axis=1)  # (H, 2H)
    b_hz = jnp.concatenate([jnp.zeros_like(params["b_z"]), params["b_z"]],
                           axis=1)                                    # (1, 2H)

    cost = pl.CostEstimate(
        flops=int(2 * T * B * H * 2 * H + 10 * T * B * H),
        transcendentals=int(3 * T * B * H),
        bytes_accessed=int(4 * (T * B * 2 * H + H * 2 * H + 2 * H + B * H)),
    )

    h_final = pl.pallas_call(
        gru_recurrence_kernel,
        out_shape=jax.ShapeDtypeStruct((B, H), jnp.float32),
        grid_spec=pltpu.PrefetchScalarGridSpec(
            num_scalar_prefetch=0,
            grid=(n_chunks,),
            in_specs=[
                # (Tc, B, 2H) slab of precomputed input projections per chunk.
                pl.BlockSpec((Tc, B, 2 * H), lambda c: (c, 0, 0)),
                # Constant-index weights (tiny here; use pl.Buffered(1) at
                # realistic sizes to single-buffer them).
                pl.BlockSpec((H, 2 * H), lambda c: (0, 0)),
                pl.BlockSpec((1, 2 * H), lambda c: (0, 0)),
            ],
            # Constant index => resident accumulator: carries h across chunks.
            out_specs=pl.BlockSpec((B, H), lambda c: (0, 0)),
        ),
        compiler_params=pltpu.CompilerParams(
            dimension_semantics=("arbitrary",)),
        cost_estimate=cost,
    )(xproj, w_hz, b_hz)

    # One-shot output projection outside the kernel (runs once, nothing to
    # fuse; keeps the vocab-sized W_o out of kernel VMEM).
    return h_final @ params["w_o"] + params["b_o"]


def basic_gru_reference(tokens, params):
    """Plain-JAX reference mirroring the PyTorch forward exactly."""
    emb = jnp.take(params["embedding"], tokens, axis=0)    # (B, T, E)
    B, T, _ = emb.shape
    H = params["b_r"].shape[-1]
    h = jnp.zeros((B, H), jnp.float32)
    for t in range(T):
        x_t = emb[:, t]
        r = jax.nn.sigmoid(x_t @ params["w_x_r"] + h @ params["w_h_r"]
                           + params["b_r"])
        z = jax.nn.sigmoid(h @ params["w_z"] + params["b_z"])
        n = jnp.tanh(x_t @ params["w_n"] + params["b_n"] + r * h)
        h = (1.0 - z) * n + z * h
    return h @ params["w_o"] + params["b_o"]


def init_params(key, vocab_size, embed_size, hidden_size, output_size):
    ks = jax.random.split(key, 10)
    s = 0.1
    return {
        # nn.Embedding(vocab_size, embed_size)
        "embedding": jax.random.normal(ks[0], (vocab_size, embed_size),
                                       jnp.float32),
        # nn.Linear(embed_size + hidden_size, hidden_size), stored transposed
        # and split into the embed-part and hidden-part of the weight.
        "w_x_r": s * jax.random.normal(ks[1], (embed_size, hidden_size),
                                       jnp.float32),
        "w_h_r": s * jax.random.normal(ks[2], (hidden_size, hidden_size),
                                       jnp.float32),
        "b_r": s * jax.random.normal(ks[3], (1, hidden_size), jnp.float32),
        # nn.Linear(hidden_size, hidden_size)  (hidden_to_hidden), transposed
        "w_z": s * jax.random.normal(ks[4], (hidden_size, hidden_size),
                                     jnp.float32),
        "b_z": s * jax.random.normal(ks[5], (1, hidden_size), jnp.float32),
        # nn.Linear(hidden_size, hidden_size)  (candidate_to_hidden), transposed
        "w_n": s * jax.random.normal(ks[6], (embed_size, hidden_size),
                                     jnp.float32),
        "b_n": s * jax.random.normal(ks[7], (1, hidden_size), jnp.float32),
        # nn.Linear(hidden_size, output_size)  (hidden_to_output), transposed
        "w_o": s * jax.random.normal(ks[8], (hidden_size, output_size),
                                     jnp.float32),
        "b_o": s * jax.random.normal(ks[9], (1, output_size), jnp.float32),
    }


if __name__ == "__main__":
    B, T = 8, 8
    vocab_size = 64
    embed_size = 32
    hidden_size = 32          # must equal embed_size (see note at top)
    output_size = vocab_size

    key = jax.random.PRNGKey(0)
    k_param, k_tok = jax.random.split(key)
    params = init_params(k_param, vocab_size, embed_size, hidden_size,
                         output_size)
    tokens = jax.random.randint(k_tok, (B, T), 0, vocab_size, dtype=jnp.int32)

    out = basic_gru_forward(tokens, params, time_chunk=4)
    out = jax.block_until_ready(out)

    ref = basic_gru_reference(tokens, params)
    assert out.shape == (B, output_size)
    assert jnp.allclose(out, ref, atol=1e-4, rtol=1e-4), (
        "Pallas output mismatch vs reference")

    print("KERNEL_OK")
</pallas_src>

<mosaic_0001>
module attributes {stable_mosaic.version = 11 : i64} {
  func.func @gru_recurrence_kernel(%arg0: i32, %arg1: memref<4x8x64xf32, #tpu.memory_space<vmem>>, %arg2: memref<32x64xf32, #tpu.memory_space<vmem>>, %arg3: memref<1x64xf32, #tpu.memory_space<vmem>>, %arg4: memref<8x32xf32, #tpu.memory_space<vmem>>) attributes {dimension_semantics = [#tpu.dimension_semantics<arbitrary>], iteration_bounds = array<i64: 2>, scalar_prefetch = 0 : i64, scratch_operands = 0 : i64, tpu.core_type = #tpu.core_type<tc>, window_params = [{transform_indices = @transform_0, window_bounds = array<i64: 4, 8, 64>}, {pipeline_mode = #tpu.pipeline_mode<synchronous>, transform_indices = @transform_1, window_bounds = array<i64: 32, 64>}, {pipeline_mode = #tpu.pipeline_mode<synchronous>, transform_indices = @transform_2, window_bounds = array<i64: 1, 64>}, {pipeline_mode = #tpu.pipeline_mode<synchronous>, transform_indices = @transform_3, window_bounds = array<i64: 8, 32>}]} {
    %c0_i32 = arith.constant 0 : i32
    %0 = arith.cmpi eq, %arg0, %c0_i32 : i32
    %1 = arith.extui %0 : i1 to i32
    %c0_i32_0 = arith.constant 0 : i32
    %2 = arith.cmpi ne, %1, %c0_i32_0 : i32
    scf.if %2 {
      %cst_32 = arith.constant 0.000000e+00 : f32
      %121 = vector.broadcast %cst_32 : f32 to vector<8x32xf32>
      %c0_33 = arith.constant 0 : index
      %c0_34 = arith.constant 0 : index
      %122 = vector.load %arg4[%c0_33, %c0_34] : memref<8x32xf32, #tpu.memory_space<vmem>>, vector<8x32xf32>
      tpu.vector_store %arg4[%c0_33, %c0_34], %121 {strides = array<i32>} : memref<8x32xf32, #tpu.memory_space<vmem>>, vector<8x32xf32>,
    } else {
    }
    %c0 = arith.constant 0 : index
    %c0_1 = arith.constant 0 : index
    %3 = vector.load %arg2[%c0, %c0_1] : memref<32x64xf32, #tpu.memory_space<vmem>>, vector<32x64xf32>
    %c0_2 = arith.constant 0 : index
    %c0_3 = arith.constant 0 : index
    %4 = vector.load %arg3[%c0_2, %c0_3] : memref<1x64xf32, #tpu.memory_space<vmem>>, vector<1x64xf32>
    %5 = vector.shape_cast %4 : vector<1x64xf32> to vector<1x64xf32>
    %6 = vector.broadcast %5 : vector<1x64xf32> to vector<8x64xf32>
    %c0_4 = arith.constant 0 : index
    %c0_5 = arith.constant 0 : index
    %7 = vector.load %arg4[%c0_4, %c0_5] : memref<8x32xf32, #tpu.memory_space<vmem>>, vector<8x32xf32>
    %c0_i32_6 = arith.constant 0 : i32
    %8 = arith.index_cast %c0_i32_6 : i32 to index
    %c0_7 = arith.constant 0 : index
    %c0_8 = arith.constant 0 : index
    %9 = vector.load %arg1[%8, %c0_7, %c0_8] : memref<4x8x64xf32, #tpu.memory_space<vmem>>, vector<1x8x64xf32>
    %10 = vector.shape_cast %9 : vector<1x8x64xf32> to vector<8x64xf32>
    %cst = arith.constant dense<0.000000e+00> : vector<8x64xf32>
    %11 = tpu.matmul %7, %3, %cst {dimension_numbers = #tpu.dot_dimension_numbers<[1], [0], [0], [1], [0, 0, 1, 1], [], []>} : vector<8x32xf32>, vector<32x64xf32>, vector<8x64xf32> -> vector<8x64xf32>
    %12 = arith.addf %11, %6 : vector<8x64xf32>
    %13 = vector.extract_strided_slice %10 {offsets = [0, 0], sizes = [8, 32], strides = [1, 1]} : vector<8x64xf32> to vector<8x32xf32>
    %14 = vector.extract_strided_slice %12 {offsets = [0, 0], sizes = [8, 32], strides = [1, 1]} : vector<8x64xf32> to vector<8x32xf32>
    %15 = arith.addf %13, %14 : vector<8x32xf32>
    %16 = arith.negf %15 : vector<8x32xf32>
    %17 = math.exp %16 : vector<8x32xf32>
    %cst_9 = arith.constant 1.000000e+00 : f32
    %18 = vector.broadcast %cst_9 : f32 to vector<8x32xf32>
    %19 = arith.addf %18, %17 : vector<8x32xf32>
    %20 = arith.divf %18, %19 : vector<8x32xf32>
    %21 = vector.extract_strided_slice %12 {offsets = [0, 32], sizes = [8, 32], strides = [1, 1]} : vector<8x64xf32> to vector<8x32xf32>
    %22 = arith.negf %21 : vector<8x32xf32>
    %23 = math.exp %22 : vector<8x32xf32>
    %cst_10 = arith.constant 1.000000e+00 : f32
    %24 = vector.broadcast %cst_10 : f32 to vector<8x32xf32>
    %25 = arith.addf %24, %23 : vector<8x32xf32>
    %26 = arith.divf %24, %25 : vector<8x32xf32>
    %27 = vector.extract_strided_slice %10 {offsets = [0, 32], sizes = [8, 32], strides = [1, 1]} : vector<8x64xf32> to vector<8x32xf32>
    %28 = arith.mulf %20, %7 : vector<8x32xf32>
    %29 = arith.addf %27, %28 : vector<8x32xf32>
    %30 = math.tanh %29 : vector<8x32xf32>
    %cst_11 = arith.constant 1.000000e+00 : f32
    %31 = vector.broadcast %cst_11 : f32 to vector<8x32xf32>
    %32 = arith.subf %31, %26 : vector<8x32xf32>
    %33 = arith.mulf %32, %30 : vector<8x32xf32>
    %34 = arith.mulf %26, %7 : vector<8x32xf32>
    %35 = arith.addf %33, %34 : vector<8x32xf32>
    %c1_i32 = arith.constant 1 : i32
    %36 = arith.index_cast %c1_i32 : i32 to index
    %c0_12 = arith.constant 0 : index
    %c0_13 = arith.constant 0 : index
    %37 = vector.load %arg1[%36, %c0_12, %c0_13] : memref<4x8x64xf32, #tpu.memory_space<vmem>>, vector<1x8x64xf32>
    %38 = vector.shape_cast %37 : vector<1x8x64xf32> to vector<8x64xf32>
    %cst_14 = arith.constant dense<0.000000e+00> : vector<8x64xf32>
    %39 = tpu.matmul %35, %3, %cst_14 {dimension_numbers = #tpu.dot_dimension_numbers<[1], [0], [0], [1], [0, 0, 1, 1], [], []>} : vector<8x32xf32>, vector<32x64xf32>, vector<8x64xf32> -> vector<8x64xf32>
    %40 = arith.addf %39, %6 : vector<8x64xf32>
    %41 = vector.extract_strided_slice %38 {offsets = [0, 0], sizes = [8, 32], strides = [1, 1]} : vector<8x64xf32> to vector<8x32xf32>
    %42 = vector.extract_strided_slice %40 {offsets = [0, 0], sizes = [8, 32], strides = [1, 1]} : vector<8x64xf32> to vector<8x32xf32>
    %43 = arith.addf %41, %42 : vector<8x32xf32>
    %44 = arith.negf %43 : vector<8x32xf32>
    %45 = math.exp %44 : vector<8x32xf32>
    %cst_15 = arith.constant 1.000000e+00 : f32
    %46 = vector.broadcast %cst_15 : f32 to vector<8x32xf32>
    %47 = arith.addf %46, %45 : vector<8x32xf32>
    %48 = arith.divf %46, %47 : vector<8x32xf32>
    %49 = vector.extract_strided_slice %40 {offsets = [0, 32], sizes = [8, 32], strides = [1, 1]} : vector<8x64xf32> to vector<8x32xf32>
    %50 = arith.negf %49 : vector<8x32xf32>
    %51 = math.exp %50 : vector<8x32xf32>
    %cst_16 = arith.constant 1.000000e+00 : f32
    %52 = vector.broadcast %cst_16 : f32 to vector<8x32xf32>
    %53 = arith.addf %52, %51 : vector<8x32xf32>
    %54 = arith.divf %52, %53 : vector<8x32xf32>
    %55 = vector.extract_strided_slice %38 {offsets = [0, 32], sizes = [8, 32], strides = [1, 1]} : vector<8x64xf32> to vector<8x32xf32>
    %56 = arith.mulf %48, %35 : vector<8x32xf32>
    %57 = arith.addf %55, %56 : vector<8x32xf32>
    %58 = math.tanh %57 : vector<8x32xf32>
    %cst_17 = arith.constant 1.000000e+00 : f32
    %59 = vector.broadcast %cst_17 : f32 to vector<8x32xf32>
    %60 = arith.subf %59, %54 : vector<8x32xf32>
    %61 = arith.mulf %60, %58 : vector<8x32xf32>
    %62 = arith.mulf %54, %35 : vector<8x32xf32>
    %63 = arith.addf %61, %62 : vector<8x32xf32>
    %c2_i32 = arith.constant 2 : i32
    %64 = arith.index_cast %c2_i32 : i32 to index
    %c0_18 = arith.constant 0 : index
    %c0_19 = arith.constant 0 : index
    %65 = vector.load %arg1[%64, %c0_18, %c0_19] : memref<4x8x64xf32, #tpu.memory_space<vmem>>, vector<1x8x64xf32>
    %66 = vector.shape_cast %65 : vector<1x8x64xf32> to vector<8x64xf32>
    %cst_20 = arith.constant dense<0.000000e+00> : vector<8x64xf32>
    %67 = tpu.matmul %63, %3, %cst_20 {dimension_numbers = #tpu.dot_dimension_numbers<[1], [0], [0], [1], [0, 0, 1, 1], [], []>} : vector<8x32xf32>, vector<32x64xf32>, vector<8x64xf32> -> vector<8x64xf32>
    %68 = arith.addf %67, %6 : vector<8x64xf32>
    %69 = vector.extract_strided_slice %66 {offsets = [0, 0], sizes = [8, 32], strides = [1, 1]} : vector<8x64xf32> to vector<8x32xf32>
    %70 = vector.extract_strided_slice %68 {offsets = [0, 0], sizes = [8, 32], strides = [1, 1]} : vector<8x64xf32> to vector<8x32xf32>
    %71 = arith.addf %69, %70 : vector<8x32xf32>
    %72 = arith.negf %71 : vector<8x32xf32>
    %73 = math.exp %72 : vector<8x32xf32>
    %cst_21 = arith.constant 1.000000e+00 : f32
    %74 = vector.broadcast %cst_21 : f32 to vector<8x32xf32>
    %75 = arith.addf %74, %73 : vector<8x32xf32>
    %76 = arith.divf %74, %75 : vector<8x32xf32>
    %77 = vector.extract_strided_slice %68 {offsets = [0, 32], sizes = [8, 32], strides = [1, 1]} : vector<8x64xf32> to vector<8x32xf32>
    %78 = arith.negf %77 : vector<8x32xf32>
    %79 = math.exp %78 : vector<8x32xf32>
    %cst_22 = arith.constant 1.000000e+00 : f32
    %80 = vector.broadcast %cst_22 : f32 to vector<8x32xf32>
    %81 = arith.addf %80, %79 : vector<8x32xf32>
    %82 = arith.divf %80, %81 : vector<8x32xf32>
    %83 = vector.extract_strided_slice %66 {offsets = [0, 32], sizes = [8, 32], strides = [1, 1]} : vector<8x64xf32> to vector<8x32xf32>
    %84 = arith.mulf %76, %63 : vector<8x32xf32>
    %85 = arith.addf %83, %84 : vector<8x32xf32>
    %86 = math.tanh %85 : vector<8x32xf32>
    %cst_23 = arith.constant 1.000000e+00 : f32
    %87 = vector.broadcast %cst_23 : f32 to vector<8x32xf32>
    %88 = arith.subf %87, %82 : vector<8x32xf32>
    %89 = arith.mulf %88, %86 : vector<8x32xf32>
    %90 = arith.mulf %82, %63 : vector<8x32xf32>
    %91 = arith.addf %89, %90 : vector<8x32xf32>
    %c3_i32 = arith.constant 3 : i32
    %92 = arith.index_cast %c3_i32 : i32 to index
    %c0_24 = arith.constant 0 : index
    %c0_25 = arith.constant 0 : index
    %93 = vector.load %arg1[%92, %c0_24, %c0_25] : memref<4x8x64xf32, #tpu.memory_space<vmem>>, vector<1x8x64xf32>
    %94 = vector.shape_cast %93 : vector<1x8x64xf32> to vector<8x64xf32>
    %cst_26 = arith.constant dense<0.000000e+00> : vector<8x64xf32>
    %95 = tpu.matmul %91, %3, %cst_26 {dimension_numbers = #tpu.dot_dimension_numbers<[1], [0], [0], [1], [0, 0, 1, 1], [], []>} : vector<8x32xf32>, vector<32x64xf32>, vector<8x64xf32> -> vector<8x64xf32>
    %96 = arith.addf %95, %6 : vector<8x64xf32>
    %97 = vector.extract_strided_slice %94 {offsets = [0, 0], sizes = [8, 32], strides = [1, 1]} : vector<8x64xf32> to vector<8x32xf32>
    %98 = vector.extract_strided_slice %96 {offsets = [0, 0], sizes = [8, 32], strides = [1, 1]} : vector<8x64xf32> to vector<8x32xf32>
    %99 = arith.addf %97, %98 : vector<8x32xf32>
    %100 = arith.negf %99 : vector<8x32xf32>
    %101 = math.exp %100 : vector<8x32xf32>
    %cst_27 = arith.constant 1.000000e+00 : f32
    %102 = vector.broadcast %cst_27 : f32 to vector<8x32xf32>
    %103 = arith.addf %102, %101 : vector<8x32xf32>
    %104 = arith.divf %102, %103 : vector<8x32xf32>
    %105 = vector.extract_strided_slice %96 {offsets = [0, 32], sizes = [8, 32], strides = [1, 1]} : vector<8x64xf32> to vector<8x32xf32>
    %106 = arith.negf %105 : vector<8x32xf32>
    %107 = math.exp %106 : vector<8x32xf32>
    %cst_28 = arith.constant 1.000000e+00 : f32
    %108 = vector.broadcast %cst_28 : f32 to vector<8x32xf32>
    %109 = arith.addf %108, %107 : vector<8x32xf32>
    %110 = arith.divf %108, %109 : vector<8x32xf32>
    %111 = vector.extract_strided_slice %94 {offsets = [0, 32], sizes = [8, 32], strides = [1, 1]} : vector<8x64xf32> to vector<8x32xf32>
    %112 = arith.mulf %104, %91 : vector<8x32xf32>
    %113 = arith.addf %111, %112 : vector<8x32xf32>
    %114 = math.tanh %113 : vector<8x32xf32>
    %cst_29 = arith.constant 1.000000e+00 : f32
    %115 = vector.broadcast %cst_29 : f32 to vector<8x32xf32>
    %116 = arith.subf %115, %110 : vector<8x32xf32>
    %117 = arith.mulf %116, %114 : vector<8x32xf32>
    %118 = arith.mulf %110, %91 : vector<8x32xf32>
    %119 = arith.addf %117, %118 : vector<8x32xf32>
    %c4_i32 = arith.constant 4 : i32
    %c0_30 = arith.constant 0 : index
    %c0_31 = arith.constant 0 : index
    %120 = vector.load %arg4[%c0_30, %c0_31] : memref<8x32xf32, #tpu.memory_space<vmem>>, vector<8x32xf32>
    tpu.vector_store %arg4[%c0_30, %c0_31], %119 {strides = array<i32>} : memref<8x32xf32, #tpu.memory_space<vmem>>, vector<8x32xf32>,
    return
  }
  func.func @transform_0(%arg0: i32) -> (i32, i32, i32) {
    %c0_i32 = arith.constant 0 : i32
    %c0_i32_0 = arith.constant 0 : i32
    %c0_i32_1 = arith.constant 0 : i32
    return %arg0, %c0_i32, %c0_i32_0 : i32, i32, i32
  }
  func.func @transform_1(%arg0: i32) -> (i32, i32) {
    %c0_i32 = arith.constant 0 : i32
    %c0_i32_0 = arith.constant 0 : i32
    %c0_i32_1 = arith.constant 0 : i32
    return %c0_i32, %c0_i32_0 : i32, i32
  }
  func.func @transform_2(%arg0: i32) -> (i32, i32) {
    %c0_i32 = arith.constant 0 : i32
    %c0_i32_0 = arith.constant 0 : i32
    %c0_i32_1 = arith.constant 0 : i32
    return %c0_i32, %c0_i32_0 : i32, i32
  }
  func.func @transform_3(%arg0: i32) -> (i32, i32) {
    %c0_i32 = arith.constant 0 : i32
    %c0_i32_0 = arith.constant 0 : i32
    %c0_i32_1 = arith.constant 0 : i32
    return %c0_i32, %c0_i32_0 : i32, i32
  }
}

</mosaic_0001>

<bundles_post_ra>
// kernel: tpu_custom_call.1
= control target key start
LH: loop header
LB: loop body
LE: loop exit
PB: predicated region body
PF: predicated region fallthrough
CT: control target
= control target key end

     0   :  { %8 = vsyncpa [#allocation3], 0  ;;  %s1262_s0 = inlined_call_operand.hbm [shape: f32[8,8,64], index: 0, kind: input, shape index: {}]   ;;  %s1263_s1 = inlined_call_operand.hbm [shape: f32[32,64], index: 1, kind: input, shape index: {}]   ;;  %s1264_s2 = inlined_call_operand.vmem [shape: f32[1,64], index: 2, kind: input, shape index: {}]   ;;  %s1265_s3 = inlined_call_operand.hbm [shape: f32[8,32], index: 3, kind: output, shape index: {}]  }
   0x1   :  { %10 = vsyncpa [#allocation3 + $0x1], 0 }
   0x2   :  { %11 = vsyncpa [#allocation6], 0 }
   0x3   :  { %12 = vsyncpa [#allocation4], 0  ;;  %s1043_s12 = smov 0   ;;  %s1045_s13 = smov 0  }
   0x4   :  { %s1047_s14 = smov 0   ;;  %s1049_s15 = smov 0  }
   0x5 LB: > { %s1062_s16 = sadd.s32 4294967295, %s1011_s15   ;;  %p38_p0 = scmp.ne.s32.totalorder %s1003_s13, %s999_s12  ;;  %s1011_s15 = sphi %s1049_s15, %s1281_s15   ;;  %s1007_s14 = sphi %s1047_s14, %s1280_s14   ;;  %s1003_s13 = sphi %s1045_s13, %s1279_s13   ;;  %s999_s12 = sphi %s1043_s12, %s1278_s12  }
   0x6   : > { %p1266_p1 = scmp.eq.s32.totalorder %s1062_s16, 0  ;;  %p692_p2 = scmp.ge.s32.totalorder %s1011_s15, 1 }
   0x7   : > { %p112_p3 = scmp.lt.s32.totalorder %s1011_s15, 3  ;;  %s1013_s19 = smov [#allocation5]  }
   0x8   : > { %p1071_p5 = por %p1266_p1, %p38_p0  ;;  %s124_s20 = sshll.u32 %s1013_s19, 4  ;;  %s125_s20 = int_to_ptr.vmem [resolvable:$true] %s124_s20 }
   0x9   : > { %p1075_p6 = pnand %p692_p2, %p112_p3  ;;  %s1088_s22 = sadd.s32 1, %s1011_s15  }
   0xa   : > { %s1269_s17 = scalar_select %p1071_p5, 1, 0 }
   0xb   : > { %s1270_s18 = scalar_select %p1075_p6, 1, 0 }
   0xc   : > { %p797_p7 = pneg %p1075_p6  ;;  %s25_s23 = sadd.s32 1, %s1007_s14 }
   0xd   : > { %s22_s24 = ssub.s32 %s1011_s15, %s1088_s22  ;;  %s902_s25 = scalar_lea.vmem %s125_s20, 512 }
   0xe   : > { %p1083_p8 = pnand %p797_p7, %p1266_p1  ;;  %p903_p10 = scmp.ne.s32.totalorder %s125_s20, %s902_s25 }
   0xf   : > { %p910_p13 = scmp.lt.s32.totalorder %s125_s20, %s125_s20  ;;  %p911_p0 = scmp.lt.s32.totalorder %s902_s25, %s902_s25 }
  0x10   : > { %p893_p9 = pneg %p1083_p8 }
  0x11   : > { %p912_p2 = por %p911_p0, %p910_p13 }
  0x12   : > { %p905_p11 = pnand %p903_p10, %p893_p9 }
  0x14   : > { %p906_p12 = pneg %p905_p11 }
  0x16   : > { %p913_p3 = pnand %p912_p2, %p906_p12 }
  0x18   : > { %916 = shalt.err (!%p913_p3)
}
  0x19   : > { %s1014_s26 = smov 128   ;;  %s1015_s27 = smov 8  }
  0x1a   : > { %800 = dma.hbm_to_vmem [thread:$0]  (!%p1083_p8), %s1263_s1, 512, %s125_s20, [#allocation6], %s1014_s26, %s1014_s26, %s1015_s27  }
  0x1b   : > { %p23_p7 = scmp.eq.s32.totalorder %s22_s24, 0  ;;  %p32_p9 = scmp.ne.s32.totalorder %s1007_s14, %s1003_s13 }
  0x1c   : > { %p33_p10 = scmp.eq.s32.totalorder %s1011_s15, 0  ;;  %p806_p11 = scmp.lt.s32.totalorder %s1011_s15, 2 }
  0x1d   : > { %s1108_s30 = scalar_select %p23_p7, %s1007_s14, %s25_s23  }
  0x1e   : > { %p34_p12 = por %p33_p10, %p32_p9  ;;  %s141_s4 = sand.u32 1, %s1007_s14  }
  0x1f   : > { %s695_s5 = sshll.u32 %s141_s4, 5  ;;  %s722_s6 = sshll.u32 %s1011_s15, 9 }
  0x20   : > { %s1115_s9 = scalar_lea.hbm %s1262_s0, %s722_s6  ;;  %s145_s10 = scalar_lea.vmem [#allocation2], %s695_s5 }
  0x21   : > { %s152_s11 = sshll.u32 %s145_s10, 4  ;;  %p1119_p8 = pnand %p806_p11, %p34_p12  ;;  %s1117_s11 = int_to_ptr.vmem [resolvable:$true] %s152_s11 }
  0x22   : > { %s1123_s19 = scalar_lea.sflag [#allocation3], %s141_s4  ;;  %s917_s15 = scalar_lea.hbm %s1115_s9, 512 }
  0x23   : > { %p918_p13 = scmp.ne.s32.totalorder %s1115_s9, %s917_s15  ;;  %p919_p0 = pneg %p1119_p8 }
  0x24   : > { %s922_s23 = scalar_lea.hbm %s1262_s0, 1024  ;;  %p923_p7 = scmp.lt.s32.totalorder %s1115_s9, %s1262_s0 }
  0x25   : > { %p920_p2 = pnand %p919_p0, %p918_p13  ;;  %p924_p9 = scmp.lt.s32.totalorder %s922_s23, %s917_s15 }
  0x27   : > { %p921_p3 = pneg %p920_p2  ;;  %p925_p10 = por %p924_p9, %p923_p7 }
  0x29   : > { %p926_p11 = pnand %p925_p10, %p921_p3 }
  0x2b   : > { %929 = shalt.err (!%p926_p11)
}
  0x2c   : > { %s930_s28 = scalar_lea.vmem %s1117_s11, 512  ;;  %s1016_s29 = smov [#allocation2]  }
  0x2d   : > { %p931_p12 = scmp.ne.s32.totalorder %s1117_s11, %s930_s28  ;;  %s935_s4 = sshll.u32 %s1016_s29, 4  ;;  %s936_s4 = int_to_ptr.vmem [resolvable:$false] %s935_s4 }
  0x2e   : > { %s937_s5 = scalar_lea.vmem %s936_s4, 1024  ;;  %p938_p2 = scmp.lt.s32.totalorder %s1117_s11, %s936_s4 }
  0x2f   : > { %p933_p4 = pnand %p931_p12, %p919_p0  ;;  %p939_p1 = scmp.lt.s32.totalorder %s937_s5, %s930_s28 }
  0x31   : > { %p934_p13 = pneg %p933_p4  ;;  %p940_p5 = por %p939_p1, %p938_p2 }
  0x33   : > { %p941_p6 = pnand %p940_p5, %p934_p13 }
  0x35   : > { %944 = shalt.err (!%p941_p6)
}
  0x36   : > { %804 = dma.hbm_to_vmem [thread:$0]  (!%p1119_p8), %s1115_s9, 512, %s1117_s11, %s1123_s19, %s1014_s26, %s1014_s26, %s1015_s27  }
  0x37   : > { %p1273_p4 = scmp.ne.s32.totalorder %s1270_s18, 0 }
  0x38   : > { %s166_s6 = sand.u32 (!%p1273_p4), 1, %s1003_s13   ;;  %p1274_p1 = scmp.ne.s32.totalorder (!%p1273_p4), %s1269_s17, 0 }
  0x39   : > { %164 = sbr.rel (%p1273_p4) target bundleno = 2013 (0x7dd), region = 32  ;;  %s699_s7 = sshll.u32 (!%p1273_p4), %s166_s6, 5 }
  0x3a   : > { %s167_s8 = scalar_lea.sflag (!%p1273_p4), [#allocation3], %s166_s6  ;;  %s1150_s10 = scalar_lea.vmem (!%p1273_p4), [#allocation2], %s699_s7 }
  0x3e   : > { %986 = dma.done.wait (%p1274_p1), %s167_s8, 512  }
  0x3f   : > { %988 = vsyncadd (%p1274_p1), %s167_s8, 4294966784  ;;  %p1275_p5 = scmp.eq.s32.totalorder %s1062_s16, 0 }
  0x41   : > { %990 = dma.done.wait (%p1275_p5), [#allocation6], 512   ;;  %p1276_p6 = pmov %p1275_p5 }
  0x42   : > { %p1277_p8 = scmp.ne.s32.totalorder %s1062_s16, 0 }
  0x43   : > { %992 = vsyncadd (%p1276_p6), [#allocation6], 4294966784 }
  0x44   : > { %196 = sbr.rel (%p1277_p8) target bundleno = 75 (0x4b), region = 44 }
  0x49   : > { %vm197_vm0 = vcmask 261120   ;;  %v1017_v0 = vmov 0.0  }
  0x4a   : > { %198 = vst.msk [vmem:[#allocation7] sm:$0xff] %vm197_vm0, %v1017_v0 }
  0x4b PF: > { %v1162_v1 = vld [vmem:[#allocation5 + $0x18] sm:$0xff]  ;;  %v1018_v2 = vmov 0.0   ;;  %v1165_v3 = vld [vmem:[#allocation5 + $0x10] sm:$0xff]  ;;  %vm1019_vm1 = vmmov 0   ;;  %v1172_v4 = vld [vmem:[#allocation5 + $0x8] sm:$0xff]  ;;  %vm212_vm2 = vcmask 261120  }
  0x4c   : > { %743 = vmatprep.subr.mxu0 %v1018_v2  ;;  %751 = vmatprep.mubr.msk.f32.mxu0 %vm1019_vm1, %v1018_v2  ;;  %v1178_v5 = vld [vmem:[#allocation5] sm:$0xff]  ;;  %s1020_s26 = smov 32   ;;  %s1021_s27 = smov 96   ;;  %v706_v31 = vld [vmem:[%s1150_s10 + $0x8] sm:$0xff]  ;;  %v710_v53 = vld [vmem:[%s1150_s10 + $0x10] sm:$0xff] }
  0x4d   : > { %744 = vmatpush3.msra.mxu0 %v1162_v1  ;;  %754 = vmatprep.subr.mxu1 %v1018_v2  ;;  %v1205_v7 = vld [vmem:[%s1264_s2] ss:$0 sm:$0xff]  ;;  %s1022_s9 = smov [#allocation7]   ;;  %p808_p0 = scmp.eq.s32.totalorder %s1062_s16, 1 }
  0x4e   : > { %745 = vmatprep.subr.mxu0 %v1018_v2  ;;  %755 = vmatpush3.msra.mxu1 %v1162_v1  ;;  %v211_v8 = vld [vmem:[%s1150_s10] sm:$0xff]  ;;  %s631_s11 = sshll.u32 %s1022_s9, 4  ;;  %s632_s11 = int_to_ptr.vmem [resolvable:$true] %s631_s11 }
  0x4f   : > { %746 = vmatpush3.msra.mxu0 %v1165_v3  ;;  %756 = vmatprep.subr.mxu1 %v1018_v2  ;;  %s945_s12 = scalar_lea.vmem %s632_s11, 128  ;;  %p952_p10 = scmp.lt.s32.totalorder %s632_s11, %s632_s11 }
  0x50   : > { %747 = vmatprep.subr.mxu0 %v1018_v2  ;;  %757 = vmatpush3.msra.mxu1 %v1165_v3  ;;  %p946_p3 = scmp.ne.s32.totalorder %s632_s11, %s945_s12  ;;  %p953_p11 = scmp.lt.s32.totalorder %s945_s12, %s945_s12 }
  0x51   : > { %748 = vmatpush3.msra.mxu0 %v1172_v4  ;;  %v210_v6 = vld [vmem:[#allocation7] sm:$0xff]  ;;  %758 = vmatprep.subr.mxu1 %v1018_v2 }
  0x52   : > { %749 = vmatprep.subr.mxu0 %v1018_v2  ;;  %759 = vmatpush3.msra.mxu1 %v1172_v4  ;;  %p947_p7 = pnand %p946_p3, %p808_p0  ;;  %p954_p12 = por %p953_p11, %p952_p10 }
  0x53   : > { %750 = vmatpush3.msra.mxu0 %v1178_v5  ;;  %760 = vmatprep.subr.mxu1 %v1018_v2 }
  0x54   : > { %752 = vmatmul.mubr.msk.f32.vlgmr.msra.gmra.mxu0 %vm212_vm2, %v210_v6  ;;  %761 = vmatpush3.msra.mxu1 %v1178_v5  ;;  %p948_p9 = pneg %p947_p7 }
  0x55   : > { %762 = vmatprep.mubr.msk.f32.mxu1 %vm1019_vm1, %v1018_v2  ;;  %765 = vmatprep.subr.mxu0 %v1018_v2 }
  0x56   : > { %766 = vmatpush3.msra.mxu0 %v1162_v1  ;;  %773 = vmatprep.mubr.msk.f32.mxu0 %vm1019_vm1, %v1018_v2  ;;  %p955_p13 = pnand %p954_p12, %p948_p9 }
  0x57   : > { %767 = vmatprep.subr.mxu0 %v1018_v2  ;;  %776 = vmatprep.subr.mxu1 %v1018_v2 }
  0x58   : > { %768 = vmatpush3.msra.mxu0 %v1165_v3 }
  0x59   : > { %769 = vmatprep.subr.mxu0 %v1018_v2 }
  0x5a   : > { %770 = vmatpush3.msra.mxu0 %v1172_v4 }
  0x5b   : > { %771 = vmatprep.subr.mxu0 %v1018_v2 }
  0x5c   : > { %772 = vmatpush3.msra.mxu0 %v1178_v5 }
 0x114   : > { %v282_v9 = vpop.f32.mrf.mxu0 }
 0x115   : > { %v283_v10 = vadd.f32 %v1205_v7, %v282_v9 }
 0x116   : > { %v753_v11 = vpop.f32.mrf.mxu0 }
 0x117   : > { %v286_v12 = vadd.f32 %v283_v10, %v211_v8  ;;  %v705_v18 = vmul.f32 -1.442695, %v283_v10 }
 0x119   : > { %v704_v13 = vmul.f32 -1.442695, %v286_v12  ;;  %v714_v12 = vld [vmem:[%s1150_s10 + $0x18] sm:$0xff] }
 0x11b   : > { %851 = vpow2.f32 %v704_v13 }
 0x128   : > { %v852_v14 = vpop.eup %851 }
 0x129   : > { %v290_v15 = vadd.f32 1.0, %v852_v14 }
 0x12b   : > { %853 = vrcp.f32 %v290_v15 }
 0x12c   : > { %855 = vpow2.f32 %v705_v18 }
 0x138   : > { %v854_v16 = vpop.eup %853 }
 0x139   : > { %v299_v17 = vmul.f32 %v854_v16, %v210_v6  ;;  %v856_v19 = vpop.eup %855 }
 0x13a   : > { %v296_v20 = vadd.f32 1.0, %v856_v19 }
 0x13b   : > { %301 = vrot.lane.b32.xlu0 %v299_v17, %s1020_s26 }
 0x13c   : > { %857 = vrcp.f32 %v296_v20 }
 0x13f   : > { %308 = vrot.lane.b32.xlu0 %v210_v6, %s1020_s26 }
 0x149   : > { %v858_v23 = vpop.eup %857 }
 0x14a   : > { %v306_v25 = vsub.f32 1.0, %v858_v23 }
 0x1ad   : > { %v302_v21 = vpop.permute.xlu0 %301 }
 0x1ae   : > { %v304_v22 = vadd.f32 %v302_v21, %v211_v8 }
 0x1b0   : > { %859 = vtanh.f32 %v304_v22 }
 0x1b1   : > { %v309_v24 = vpop.permute.xlu0 %308 }
 0x1b2   : > { %v311_v27 = vmul.f32 %v858_v23, %v309_v24 }
 0x1bd   : > { %v860_v26 = vpop.eup %859 }
 0x1be   : > { %v307_v28 = vmul.f32 %v860_v26, %v306_v25 }
 0x1c0   : > { %v312_v29 = vadd.f32 %v311_v27, %v307_v28 }
 0x1c2   : > { %316 = vrot.lane.b32.xlu1 %v312_v29, %s1021_s27 }
 0x234   : > { %v317_v30 = vpop.permute.xlu1 %316 }
 0x235   : > { %763 = vmatmul.mubr.msk.f32.vlgmr.msra.gmra.mxu1 %vm212_vm2, %v317_v30 }
 0x236   : > { %777 = vmatpush3.msra.mxu1 %v1162_v1  ;;  %784 = vmatprep.mubr.msk.f32.mxu1 %vm1019_vm1, %v1018_v2 }
 0x237   : > { %778 = vmatprep.subr.mxu1 %v1018_v2 }
 0x238   : > { %779 = vmatpush3.msra.mxu1 %v1165_v3 }
 0x239   : > { %780 = vmatprep.subr.mxu1 %v1018_v2 }
 0x23a   : > { %781 = vmatpush3.msra.mxu1 %v1172_v4 }
 0x23b   : > { %782 = vmatprep.subr.mxu1 %v1018_v2 }
 0x23c   : > { %783 = vmatpush3.msra.mxu1 %v1178_v5 }
 0x2f5   : > { %v386_v32 = vpop.f32.mrf.mxu1 }
 0x2f6   : > { %v387_v33 = vadd.f32 %v1205_v7, %v386_v32 }
 0x2f7   : > { %v764_v34 = vpop.f32.mrf.mxu1 }
 0x2f8   : > { %v390_v35 = vadd.f32 %v706_v31, %v387_v33  ;;  %v709_v41 = vmul.f32 -1.442695, %v387_v33 }
 0x2fa   : > { %v708_v36 = vmul.f32 -1.442695, %v390_v35 }
 0x2fc   : > { %861 = vpow2.f32 %v708_v36 }
 0x309   : > { %v862_v37 = vpop.eup %861 }
 0x30a   : > { %v394_v38 = vadd.f32 1.0, %v862_v37 }
 0x30c   : > { %863 = vrcp.f32 %v394_v38 }
 0x30d   : > { %865 = vpow2.f32 %v709_v41 }
 0x319   : > { %v864_v39 = vpop.eup %863 }
 0x31a   : > { %v404_v40 = vmul.f32 %v864_v39, %v317_v30  ;;  %v866_v42 = vpop.eup %865 }
 0x31b   : > { %v400_v43 = vadd.f32 1.0, %v866_v42 }
 0x31c   : > { %406 = vrot.lane.b32.xlu1 %v404_v40, %s1020_s26 }
 0x31d   : > { %867 = vrcp.f32 %v400_v43 }
 0x32a   : > { %v868_v46 = vpop.eup %867 }
 0x32b   : > { %v411_v47 = vsub.f32 1.0, %v868_v46  ;;  %v413_v50 = vmul.f32 %v868_v46, %v312_v29 }
 0x38e   : > { %v407_v44 = vpop.permute.xlu1 %406 }
 0x38f   : > { %v409_v45 = vadd.f32 %v706_v31, %v407_v44 }
 0x391   : > { %869 = vtanh.f32 %v409_v45 }
 0x39e   : > { %v870_v48 = vpop.eup %869 }
 0x39f   : > { %v412_v49 = vmul.f32 %v870_v48, %v411_v47 }
 0x3a1   : > { %v414_v51 = vadd.f32 %v413_v50, %v412_v49 }
 0x3a3   : > { %418 = vrot.lane.b32.xlu0 %v414_v51, %s1021_s27 }
 0x415   : > { %v419_v52 = vpop.permute.xlu0 %418 }
 0x416   : > { %774 = vmatmul.mubr.msk.f32.vlgmr.msra.gmra.mxu0 %vm212_vm2, %v419_v52 }
 0x4d6   : > { %v488_v54 = vpop.f32.mrf.mxu0 }
 0x4d7   : > { %v489_v55 = vadd.f32 %v1205_v7, %v488_v54 }
 0x4d8   : > { %v775_v56 = vpop.f32.mrf.mxu0 }
 0x4d9   : > { %v492_v57 = vadd.f32 %v710_v53, %v489_v55  ;;  %v713_v63 = vmul.f32 -1.442695, %v489_v55 }
 0x4db   : > { %v712_v58 = vmul.f32 -1.442695, %v492_v57 }
 0x4dd   : > { %871 = vpow2.f32 %v712_v58 }
 0x4ea   : > { %v872_v59 = vpop.eup %871 }
 0x4eb   : > { %v496_v60 = vadd.f32 1.0, %v872_v59 }
 0x4ed   : > { %873 = vrcp.f32 %v496_v60 }
 0x4ee   : > { %875 = vpow2.f32 %v713_v63 }
 0x4fa   : > { %v874_v61 = vpop.eup %873 }
 0x4fb   : > { %v506_v62 = vmul.f32 %v874_v61, %v419_v52  ;;  %v876_v0 = vpop.eup %875 }
 0x4fc   : > { %v502_v1 = vadd.f32 1.0, %v876_v0 }
 0x4fd   : > { %508 = vrot.lane.b32.xlu1 %v506_v62, %s1020_s26 }
 0x4fe   : > { %877 = vrcp.f32 %v502_v1 }
 0x50b   : > { %v878_v4 = vpop.eup %877 }
 0x50c   : > { %v513_v5 = vsub.f32 1.0, %v878_v4  ;;  %v515_v9 = vmul.f32 %v878_v4, %v414_v51 }
 0x56f   : > { %v509_v2 = vpop.permute.xlu1 %508 }
 0x570   : > { %v511_v3 = vadd.f32 %v710_v53, %v509_v2 }
 0x572   : > { %879 = vtanh.f32 %v511_v3 }
 0x57f   : > { %v880_v6 = vpop.eup %879 }
 0x580   : > { %v514_v8 = vmul.f32 %v880_v6, %v513_v5 }
 0x582   : > { %v516_v10 = vadd.f32 %v515_v9, %v514_v8 }
 0x584   : > { %520 = vrot.lane.b32.xlu0 %v516_v10, %s1021_s27 }
 0x5f6   : > { %v521_v11 = vpop.permute.xlu0 %520 }
 0x5f7   : > { %785 = vmatmul.mubr.msk.f32.vlgmr.msra.gmra.mxu1 %vm212_vm2, %v521_v11 }
 0x6b7   : > { %v590_v13 = vpop.f32.mrf.mxu1 }
 0x6b8   : > { %v591_v14 = vadd.f32 %v1205_v7, %v590_v13 }
 0x6b9   : > { %v786_v15 = vpop.f32.mrf.mxu1 }
 0x6ba   : > { %v594_v16 = vadd.f32 %v714_v12, %v591_v14  ;;  %v717_v22 = vmul.f32 -1.442695, %v591_v14 }
 0x6bc   : > { %v716_v17 = vmul.f32 -1.442695, %v594_v16 }
 0x6be   : > { %881 = vpow2.f32 %v716_v17 }
 0x6cb   : > { %v882_v18 = vpop.eup %881 }
 0x6cc   : > { %v598_v19 = vadd.f32 1.0, %v882_v18 }
 0x6ce   : > { %883 = vrcp.f32 %v598_v19 }
 0x6cf   : > { %885 = vpow2.f32 %v717_v22 }
 0x6db   : > { %v884_v20 = vpop.eup %883 }
 0x6dc   : > { %v608_v21 = vmul.f32 %v884_v20, %v521_v11  ;;  %v886_v23 = vpop.eup %885 }
 0x6dd   : > { %v604_v24 = vadd.f32 1.0, %v886_v23 }
 0x6de   : > { %610 = vrot.lane.b32.xlu1 %v608_v21, %s1020_s26 }
 0x6df   : > { %887 = vrcp.f32 %v604_v24 }
 0x6ec   : > { %v888_v7 = vpop.eup %887 }
 0x6ed   : > { %v615_v27 = vsub.f32 1.0, %v888_v7  ;;  %v617_v30 = vmul.f32 %v888_v7, %v516_v10 }
 0x750   : > { %v611_v25 = vpop.permute.xlu1 %610 }
 0x751   : > { %v613_v26 = vadd.f32 %v714_v12, %v611_v25 }
 0x753   : > { %889 = vtanh.f32 %v613_v26 }
 0x760   : > { %v890_v28 = vpop.eup %889 }
 0x761   : > { %v616_v29 = vmul.f32 %v890_v28, %v615_v27 }
 0x763   : > { %v618_v31 = vadd.f32 %v617_v30, %v616_v29 }
 0x765   : > { %620 = vrot.lane.b32.xlu0 %v618_v31, %s1021_s27 }
 0x7d7   : > { %v621_v32 = vpop.permute.xlu0 %620 }
 0x7d8   : > { %623 = vst.msk [vmem:[#allocation7] sm:$0xff] %vm212_vm2, %v621_v32 }
 0x7d9   : > { %958 = shalt.err (!%p955_p13)
}
 0x7da   : > { %794 = dma.vmem_to_hbm [thread:$0]  (%p808_p0), %s632_s11, 128, %s1265_s3, [#allocation4]  }
 0x7db   : > { %994 = dma.done.wait (%p808_p0), [#allocation4], 128  }
 0x7dc   : > { %996 = vsyncadd (%p808_p0), [#allocation4], 4294967168 }
 0x7dd PF: > { %p15_p2 = scmp.ge.s32.totalorder %s1088_s22, 4   ;;  %s1278_s12 = smov %s1003_s13 }
 0x7de   : > { %s1279_s13 = smov %s1007_s14  ;;  %s1280_s14 = smov %s1108_s30 }
 0x7df   : > { %s1281_s15 = smov %s1088_s22  ;;  %17 = sbr.rel (!%p15_p2) target bundleno = 5 (0x5), region = 80 }
 0x7e4   :  { %644 = vsyncpa [#allocation3], 1 }
 0x7e5   :  { %646 = vsyncpa [#allocation3 + $0x1], 1 }
 0x7e6   :  { %647 = vsyncpa [#allocation6], 1 }
 0x7e7   :  { %648 = vsyncpa [#allocation4], 1 }
 0x7e8   :  { %650 = vsyncpa [#allocation4 + $0x1], 1 }

</bundles_post_ra>
